<compile_context>
chip_gen: v7x
topology: tpu7x:2x2x1
jax: 0.10.0
libtpu: 0.0.40
codegen_flags: <defaults>
</compile_context>

<pallas_src>
import functools
import math

import jax
import jax.numpy as jnp
from jax.experimental import pallas as pl
from jax.experimental.pallas import tpu as pltpu

SUB = 8          # sublane quantum (channel / K padding)
LANE = 128       # lane quantum (spatial M padding)
TN_CAP = 2048    # lane-tile cap; only relevant at real resolution

NC = 1                                         # number of detection classes
ANCHORS = [[3.0, 4.0, 6.0, 8.0, 10.0, 13.0]]   # one level, 3 anchors (fwd-unused)

# Architecture (documentation; forward below follows it exactly, with the two
# seg branches merged into one path and the Detect head merged into the first
# seg conv at build time):
BLOCK_CFG = [
    [6, 10, 14],
    [-1,      "Conv",     [3, 8, 3, 2]],            # 0   H/2
    [-1,      "Conv",     [8, 16, 3, 2]],           # 1   H/4
    [-1,      "Conv",     [16, 16, 3, 1]],          # 2   H/4   (saved)
    [-1,      "Conv",     [16, 32, 3, 2]],          # 3   H/8
    [-1,      "Upsample", [None, 2, "nearest"]],    # 4   H/4
    [[-1, 2], "Concat",   [1]],                     # 5   H/4  C=48 (saved)
    [[5],     "Detect",   [NC, ANCHORS, [48]]],     # 6   detect head
    [5,       "Conv",     [48, 8, 3, 1]],           # 7   seg1 branch
    [-1,      "Upsample", [None, 2, "nearest"]],    # 8
    [-1,      "Conv",     [8, 2, 3, 1]],            # 9
    [-1,      "Upsample", [None, 2, "nearest"]],    # 10  seg1 out (sigmoid)
    [5,       "Conv",     [48, 8, 3, 1]],           # 11  seg2 branch
    [-1,      "Upsample", [None, 2, "nearest"]],    # 12
    [-1,      "Conv",     [8, 2, 3, 1]],            # 13
    [-1,      "Upsample", [None, 2, "nearest"]],    # 14  seg2 out (sigmoid)
]


def _round_up(x, m):
    return (x + m - 1) // m * m


# ---------------------------------------------------------------- Pallas kernel
def _matmul_act_kernel(w_ref, x_ref, b_ref, o_ref, *, act, act_rows):
    # o[N, M] = act(W[N, K] @ X[K, M] + b[N, 1]); bf16 operands, f32 accumulate,
    # f32 epilogue (v5e VPU/EUP have no bf16).
    acc = jnp.dot(w_ref[...], x_ref[...], preferred_element_type=jnp.float32)
    acc = acc + b_ref[...]
    if act == "hardswish":                       # x * relu6(x+3) / 6
        acc = acc * jnp.clip(acc + 3.0, 0.0, 6.0) * (1.0 / 6.0)
    elif act == "sigmoid":                       # exp -> EUP, approx recip -> EUP
        acc = pl.reciprocal(1.0 + jnp.exp(-acc), approx=True)
    elif act == "hardswish_rows":                # hardswish on rows < act_rows, linear after
        row = jax.lax.broadcasted_iota(jnp.int32, acc.shape, 0)
        hsw = acc * jnp.clip(acc + 3.0, 0.0, 6.0) * (1.0 / 6.0)
        acc = jnp.where(row < act_rows, hsw, acc)
    # act == "linear": nothing
    o_ref[...] = acc


def fused_matmul_act(w, x, b, act, act_rows=0):
    """act(w @ x + b): w (Np, Kp) bf16, x (Kp, M) bf16, b (Np, 1) f32 -> (Np, M) f32.

    Np, Kp are pre-padded to multiples of 8 at pack time; M (the lane dim) is
    padded here to a multiple of 128 so every output store is lane-dense.
    """
    Np, Kp = w.shape
    Kx, M = x.shape
    assert Kx == Kp, (w.shape, x.shape)

    if M <= TN_CAP:
        Mp = _round_up(M, LANE)
        tn = Mp                     # single grid step at toy sizes
    else:
        Mp = _round_up(M, TN_CAP)
        tn = TN_CAP
    if Mp != M:
        x = jnp.pad(x, ((0, 0), (0, Mp - M)))

    out = pl.pallas_call(
        functools.partial(_matmul_act_kernel, act=act, act_rows=act_rows),
        out_shape=jax.ShapeDtypeStruct((Np, Mp), jnp.float32),
        grid_spec=pltpu.PrefetchScalarGridSpec(
            num_scalar_prefetch=0,
            grid=(Mp // tn,),
            in_specs=[
                pl.BlockSpec((Np, Kp), lambda i: (0, 0)),   # weights: block == full array
                pl.BlockSpec((Kp, tn), lambda i: (0, i)),   # patches: tiled on lanes
                pl.BlockSpec((Np, 1), lambda i: (0, 0)),    # bias
            ],
            out_specs=pl.BlockSpec((Np, tn), lambda i: (0, i)),
        ),
        compiler_params=pltpu.CompilerParams(
            dimension_semantics=("parallel",)),
    )(w, x, b)
    return out[:, :M] if Mp != M else out


# ---------------------------------------------------------------- JAX glue
def im2col_cfirst(x, k, s, p, kp):
    """x (C, N, H, W) -> patches_T (kp, N*Ho*Wo); rows ordered (dy, dx, c).

    Rows K..kp-1 are zero (exact: the matching weight columns are zero too).
    TODO(synk): at real YOLOP resolution move im2col into the kernel (tap grid
    axis + shifted-window index_map + VMEM accumulator) to cut activation HBM
    traffic ~9x; at this toy size the net is launch-overhead bound.
    """
    c, n, h, w = x.shape
    if p:
        x = jnp.pad(x, ((0, 0), (0, 0), (p, p), (p, p)))
    ho = (h + 2 * p - k) // s + 1
    wo = (w + 2 * p - k) // s + 1
    rows = [x[:, :, dy:dy + s * ho:s, dx:dx + s * wo:s]
            for dy in range(k) for dx in range(k)]          # each (c, n, ho, wo)
    pat = jnp.stack(rows, axis=0).reshape(k * k * c, n * ho * wo)
    K = k * k * c
    if kp > K:
        pat = jnp.pad(pat, ((0, kp - K), (0, 0)))
    return pat, (n, ho, wo)


def conv_block(x_cf, blk):
    """YOLOP Conv = Conv2d(no bias) + BN(eval, folded) + activation.

    x_cf is channel-first (C, N, H, W); returns (Cout, N, Ho, Wo)."""
    pat, (n, ho, wo) = im2col_cfirst(x_cf, blk["k"], blk["s"], blk["p"], blk["kp"])
    out = fused_matmul_act(blk["w"], pat.astype(jnp.bfloat16), blk["b"],
                           blk["act"], blk["act_rows"])
    cout = blk["cout"]
    return out[:cout].reshape(cout, n, ho, wo)


def upsample2x_cf(x):
    # nn.Upsample(scale_factor=2, mode='nearest') on (C, N, H, W) -- XLA glue.
    # TODO(synk): fold into the consumer conv's patch indexing (floor(i/2) in
    # the im2col / tap-grid index_map) to drop the HBM roundtrip at real res.
    return jnp.repeat(jnp.repeat(x, 2, axis=2), 2, axis=3)


def mcnet_forward(params, x_nchw):
    # NCHW -> channel-first (C, N, H, W); spatial stays on lanes everywhere.
    x = jnp.transpose(x_nchw, (1, 0, 2, 3)).astype(jnp.float32)

    # ---- backbone (blocks 0..5) ----
    f0 = conv_block(x, params["c0"])          # (8,  N, H/2, W/2)
    f1 = conv_block(f0, params["c1"])         # (16, N, H/4, W/4)
    f2 = conv_block(f1, params["c2"])         # (16, N, H/4, W/4)  save[2]
    f3 = conv_block(f2, params["c3"])         # (32, N, H/8, W/8)
    f4 = upsample2x_cf(f3)                    # (32, N, H/4, W/4)
    f5 = jnp.concatenate([f4, f2], axis=0)    # Concat dim=1 (NCHW) == channel axis, C=48
    # TODO(synk): when im2col lives in the kernel, feed f4/f2 as two refs and
    # accumulate the K-partials instead of materializing the concat.

    # ---- merged head over f5: segA twins (ch 0..15, hardswish) + Detect (ch 16..33, linear)
    h = conv_block(f5, params["head"])        # (34, N, H/4, W/4)

    # Detect (training mode): (bs, na, ny, nx, no), channel index c = a*no + o
    na, no = params["det_meta"]["na"], params["det_meta"]["no"]
    d = h[16:16 + na * no]                    # (na*no, N, ny, nx)
    _, n, ny, nx = d.shape
    det = jnp.transpose(d.reshape(na, no, n, ny, nx), (2, 0, 3, 4, 1))
    det_out = [det]

    # ---- merged seg path (blocks 8..10 / 12..14) ----
    s = h[0:16]                               # (16, N, H/4, W/4)
    s = upsample2x_cf(s)                      # H/2
    s = conv_block(s, params["segB"])         # (4, N, H/2, W/2), sigmoid fused
    s = upsample2x_cf(s)                      # H   (sigmoid o nearest == nearest o sigmoid)
    s = jnp.transpose(s, (1, 0, 2, 3))        # -> NCHW (N, 4, H, W)
    seg1, seg2 = s[:, 0:2], s[:, 2:4]

    return [det_out, seg1, seg2]
    # TODO(synk): toy-scale option per review -- fold the whole forward into a
    # single pallas_call with all feature maps resident in VMEM scratch; kept
    # as separate lane-dense conv kernels here for robust Mosaic lowering.


# ---------------------------------------------------------------- parameters
def _pack_conv(w_kc, bias, k, s, p, act, act_rows=0):
    """Pack a conv for the flipped layout.

    w_kc: (K, Cout), rows in im2col order (dy, dx, cin).
    Stored as W_T (Cout_pad8, K_pad8) bf16 and bias (Cout_pad8, 1) f32.
    Padded rows/cols are zero (exact; padded output rows are sliced off).
    """
    K, cout = w_kc.shape
    kp = _round_up(K, SUB)
    np_ = _round_up(cout, SUB)
    wp = jnp.zeros((np_, kp), jnp.float32).at[:cout, :K].set(w_kc.T)
    wp = wp.astype(jnp.bfloat16)
    bp = jnp.zeros((np_, 1), jnp.float32).at[:cout, 0].set(
        jnp.asarray(bias, jnp.float32))
    return dict(w=wp, b=bp, k=k, s=s, p=p, kp=kp, cout=cout,
                act=act, act_rows=act_rows)


def build_params(key):
    keys = jax.random.split(key, 10)
    # initialize_weights() sets BN eps=1e-3; eval-mode BN with fresh running
    # stats (mean=0, var=1, gamma=1, beta=0) folds into a weight scale.
    bn_scale = 1.0 / math.sqrt(1.0 + 1e-3)

    def conv_w(k_, cin, cout, ksz):
        w = jax.random.normal(k_, (cout, cin, ksz, ksz), jnp.float32) * 0.05
        # PyTorch (cout, cin, kh, kw) -> im2col rows (kh, kw, cin)
        w = jnp.transpose(w, (2, 3, 1, 0)).reshape(ksz * ksz * cin, cout)
        return w * bn_scale

    # backbone convs (blocks 0-3), all 3x3, BN folded, hardswish, zero bias
    c0 = _pack_conv(conv_w(keys[0], 3, 8, 3), jnp.zeros(8), 3, 2, 1, "hardswish")
    c1 = _pack_conv(conv_w(keys[1], 8, 16, 3), jnp.zeros(16), 3, 2, 1, "hardswish")
    c2 = _pack_conv(conv_w(keys[2], 16, 16, 3), jnp.zeros(16), 3, 1, 1, "hardswish")
    c3 = _pack_conv(conv_w(keys[3], 16, 32, 3), jnp.zeros(32), 3, 2, 1, "hardswish")

    # Detect head (block 6): single level, 1x1 conv with bias (no BN), linear.
    na, no = len(ANCHORS[0]) // 2, NC + 5
    wd = jax.random.normal(keys[4], (na * no, 48, 1, 1), jnp.float32) * 0.05
    wd = jnp.transpose(wd, (2, 3, 1, 0)).reshape(48, na * no)
    bd = jax.random.normal(keys[5], (na * no,), jnp.float32) * 0.05
    bd = bd.reshape(na, no)
    stride = 4.0  # this cfg: detect level sits at H/4 (dry run 128 -> 32)
    bd = bd.at[:, 4].add(math.log(8.0 / (640.0 / stride) ** 2))   # MCnet._initialize_biases
    bd = bd.at[:, 5:].add(math.log(0.6 / (NC - 0.99)))
    bd_flat = bd.reshape(-1)

    # Seg branch weights generated per-block exactly as in the reference model.
    w7 = conv_w(keys[6], 48, 8, 3)     # block 7:  48 -> 8
    w9 = conv_w(keys[7], 8, 2, 3)      # block 9:   8 -> 2
    w11 = conv_w(keys[8], 48, 8, 3)    # block 11: 48 -> 8
    w13 = conv_w(keys[9], 8, 2, 3)     # block 13:  8 -> 2

    # Merged head over f5: segA twins stacked along N (ch 0..15) plus the
    # Detect 1x1 embedded at the centre tap of the 3x3 kernel (ch 16..33).
    # Exact: a 1x1 conv equals the (dy=1,dx=1) tap of a 3x3/stride1/pad1 conv.
    Kh = 9 * 48
    wh = jnp.zeros((Kh, 34), jnp.float32)
    wh = wh.at[:, 0:8].set(w7).at[:, 8:16].set(w11)
    center = (1 * 3 + 1) * 48
    wh = wh.at[center:center + 48, 16:34].set(wd)
    bh = jnp.zeros((34,), jnp.float32).at[16:34].set(bd_flat)
    head = _pack_conv(wh, bh, 3, 1, 1, "hardswish_rows", act_rows=16)

    # stage B: both 8->2 convs as one block-diagonal 16->4 conv; sigmoid fused
    # (exact: it commutes with the trailing NEAREST-neighbour upsample).
    wB = jnp.zeros((9 * 16, 4), jnp.float32)
    for t in range(9):
        wB = wB.at[t * 16:t * 16 + 8, 0:2].set(w9[t * 8:(t + 1) * 8, :])
        wB = wB.at[t * 16 + 8:t * 16 + 16, 2:4].set(w13[t * 8:(t + 1) * 8, :])
    segB = _pack_conv(wB, jnp.zeros(4), 3, 1, 1, "sigmoid")

    return dict(c0=c0, c1=c1, c2=c2, c3=c3,
                head=head, det_meta=dict(na=na, no=no),
                segB=segB)


# TODO(synk): init-time anchor/stride calibration (check_anchor_order, the dry
# forward with a 128x128 zero image) only rescales Detect.anchors, which the
# training-mode forward never reads; it is not reproduced here.

if __name__ == "__main__":
    key = jax.random.PRNGKey(0)
    pkey, xkey = jax.random.split(key)
    params = build_params(pkey)

    x = jax.random.normal(xkey, (2, 3, 32, 32), jnp.float32)  # NCHW, like PyTorch

    fwd = jax.jit(lambda xin: mcnet_forward(params, xin))
    det_out, seg1, seg2 = fwd(x)

    # Detect (training mode): one level -> (bs, na, ny, nx, no) = (2, 3, 8, 8, 6)
    assert det_out[0].shape == (2, 3, 8, 8, 6), det_out[0].shape
    # Seg heads: sigmoid maps at input resolution, NCHW (2, 2, 32, 32)
    assert seg1.shape == (2, 2, 32, 32) and seg2.shape == (2, 2, 32, 32)

    jax.block_until_ready(det_out[0])
    jax.block_until_ready(seg1)
    jax.block_until_ready(seg2)
    print("KERNEL_OK")
</pallas_src>

<mosaic_0001>
module attributes {stable_mosaic.version = 11 : i64} {
  func.func @_matmul_act_kernel(%arg0: i32, %arg1: memref<8x32xbf16, #tpu.memory_space<vmem>>, %arg2: memref<32x512xbf16, #tpu.memory_space<vmem>>, %arg3: memref<8x1xf32, #tpu.memory_space<vmem>>, %arg4: memref<8x512xf32, #tpu.memory_space<vmem>>) attributes {dimension_semantics = [#tpu.dimension_semantics<parallel>], iteration_bounds = array<i64: 1>, scalar_prefetch = 0 : i64, scratch_operands = 0 : i64, tpu.core_type = #tpu.core_type<tc>, window_params = [{pipeline_mode = #tpu.pipeline_mode<synchronous>, transform_indices = @transform_0, window_bounds = array<i64: 8, 32>}, {transform_indices = @transform_1, window_bounds = array<i64: 32, 512>}, {pipeline_mode = #tpu.pipeline_mode<synchronous>, transform_indices = @transform_2, window_bounds = array<i64: 8, 1>}, {transform_indices = @transform_3, window_bounds = array<i64: 8, 512>}]} {
    %c0 = arith.constant 0 : index
    %c0_0 = arith.constant 0 : index
    %0 = vector.load %arg1[%c0, %c0_0] : memref<8x32xbf16, #tpu.memory_space<vmem>>, vector<8x32xbf16>
    %c0_1 = arith.constant 0 : index
    %c0_2 = arith.constant 0 : index
    %1 = vector.load %arg2[%c0_1, %c0_2] : memref<32x512xbf16, #tpu.memory_space<vmem>>, vector<32x512xbf16>
    %cst = arith.constant dense<0.000000e+00> : vector<8x512xf32>
    %2 = tpu.matmul %0, %1, %cst {dimension_numbers = #tpu.dot_dimension_numbers<[1], [0], [0], [1], [0, 0, 1, 1], [], []>} : vector<8x32xbf16>, vector<32x512xbf16>, vector<8x512xf32> -> vector<8x512xf32>
    %c0_3 = arith.constant 0 : index
    %c0_4 = arith.constant 0 : index
    %3 = vector.load %arg3[%c0_3, %c0_4] : memref<8x1xf32, #tpu.memory_space<vmem>>, vector<8x1xf32>
    %4 = vector.broadcast %3 : vector<8x1xf32> to vector<8x512xf32>
    %5 = arith.addf %2, %4 : vector<8x512xf32>
    %cst_5 = arith.constant 3.000000e+00 : f32
    %6 = vector.broadcast %cst_5 : f32 to vector<8x512xf32>
    %7 = arith.addf %5, %6 : vector<8x512xf32>
    %cst_6 = arith.constant 0.000000e+00 : f32
    %cst_7 = arith.constant 6.000000e+00 : f32
    %8 = vector.broadcast %cst_6 : f32 to vector<8x512xf32>
    %9 = arith.maximumf %8, %7 : vector<8x512xf32>
    %10 = vector.broadcast %cst_7 : f32 to vector<8x512xf32>
    %11 = arith.minimumf %10, %9 : vector<8x512xf32>
    %12 = arith.mulf %5, %11 : vector<8x512xf32>
    %cst_8 = arith.constant 0.166666672 : f32
    %13 = vector.broadcast %cst_8 : f32 to vector<8x512xf32>
    %14 = arith.mulf %12, %13 : vector<8x512xf32>
    %c0_9 = arith.constant 0 : index
    %c0_10 = arith.constant 0 : index
    %15 = vector.load %arg4[%c0_9, %c0_10] : memref<8x512xf32, #tpu.memory_space<vmem>>, vector<8x512xf32>
    tpu.vector_store %arg4[%c0_9, %c0_10], %14 {strides = array<i32>} : memref<8x512xf32, #tpu.memory_space<vmem>>, vector<8x512xf32>,
    return
  }
  func.func @transform_0(%arg0: i32) -> (i32, i32) {
    %c0_i32 = arith.constant 0 : i32
    %c0_i32_0 = arith.constant 0 : i32
    %c0_i32_1 = arith.constant 0 : i32
    return %c0_i32, %c0_i32_0 : i32, i32
  }
  func.func @transform_1(%arg0: i32) -> (i32, i32) {
    %c0_i32 = arith.constant 0 : i32
    %c0_i32_0 = arith.constant 0 : i32
    return %c0_i32, %arg0 : i32, i32
  }
  func.func @transform_2(%arg0: i32) -> (i32, i32) {
    %c0_i32 = arith.constant 0 : i32
    %c0_i32_0 = arith.constant 0 : i32
    %c0_i32_1 = arith.constant 0 : i32
    return %c0_i32, %c0_i32_0 : i32, i32
  }
  func.func @transform_3(%arg0: i32) -> (i32, i32) {
    %c0_i32 = arith.constant 0 : i32
    %c0_i32_0 = arith.constant 0 : i32
    return %c0_i32, %arg0 : i32, i32
  }
}

module attributes {stable_mosaic.version = 11 : i64} {
  func.func @_matmul_act_kernel(%arg0: i32, %arg1: memref<16x72xbf16, #tpu.memory_space<vmem>>, %arg2: memref<72x128xbf16, #tpu.memory_space<vmem>>, %arg3: memref<16x1xf32, #tpu.memory_space<vmem>>, %arg4: memref<16x128xf32, #tpu.memory_space<vmem>>) attributes {dimension_semantics = [#tpu.dimension_semantics<parallel>], iteration_bounds = array<i64: 1>, scalar_prefetch = 0 : i64, scratch_operands = 0 : i64, tpu.core_type = #tpu.core_type<tc>, window_params = [{pipeline_mode = #tpu.pipeline_mode<synchronous>, transform_indices = @transform_0, window_bounds = array<i64: 16, 72>}, {transform_indices = @transform_1, window_bounds = array<i64: 72, 128>}, {pipeline_mode = #tpu.pipeline_mode<synchronous>, transform_indices = @transform_2, window_bounds = array<i64: 16, 1>}, {transform_indices = @transform_3, window_bounds = array<i64: 16, 128>}]} {
    %c0 = arith.constant 0 : index
    %c0_0 = arith.constant 0 : index
    %0 = vector.load %arg1[%c0, %c0_0] : memref<16x72xbf16, #tpu.memory_space<vmem>>, vector<16x72xbf16>
    %c0_1 = arith.constant 0 : index
    %c0_2 = arith.constant 0 : index
    %1 = vector.load %arg2[%c0_1, %c0_2] : memref<72x128xbf16, #tpu.memory_space<vmem>>, vector<72x128xbf16>
    %cst = arith.constant dense<0.000000e+00> : vector<16x128xf32>
    %2 = tpu.matmul %0, %1, %cst {dimension_numbers = #tpu.dot_dimension_numbers<[1], [0], [0], [1], [0, 0, 1, 1], [], []>} : vector<16x72xbf16>, vector<72x128xbf16>, vector<16x128xf32> -> vector<16x128xf32>
    %c0_3 = arith.constant 0 : index
    %c0_4 = arith.constant 0 : index
    %3 = vector.load %arg3[%c0_3, %c0_4] : memref<16x1xf32, #tpu.memory_space<vmem>>, vector<16x1xf32>
    %4 = vector.broadcast %3 : vector<16x1xf32> to vector<16x128xf32>
    %5 = arith.addf %2, %4 : vector<16x128xf32>
    %cst_5 = arith.constant 3.000000e+00 : f32
    %6 = vector.broadcast %cst_5 : f32 to vector<16x128xf32>
    %7 = arith.addf %5, %6 : vector<16x128xf32>
    %cst_6 = arith.constant 0.000000e+00 : f32
    %cst_7 = arith.constant 6.000000e+00 : f32
    %8 = vector.broadcast %cst_6 : f32 to vector<16x128xf32>
    %9 = arith.maximumf %8, %7 : vector<16x128xf32>
    %10 = vector.broadcast %cst_7 : f32 to vector<16x128xf32>
    %11 = arith.minimumf %10, %9 : vector<16x128xf32>
    %12 = arith.mulf %5, %11 : vector<16x128xf32>
    %cst_8 = arith.constant 0.166666672 : f32
    %13 = vector.broadcast %cst_8 : f32 to vector<16x128xf32>
    %14 = arith.mulf %12, %13 : vector<16x128xf32>
    %c0_9 = arith.constant 0 : index
    %c0_10 = arith.constant 0 : index
    %15 = vector.load %arg4[%c0_9, %c0_10] : memref<16x128xf32, #tpu.memory_space<vmem>>, vector<16x128xf32>
    tpu.vector_store %arg4[%c0_9, %c0_10], %14 {strides = array<i32>} : memref<16x128xf32, #tpu.memory_space<vmem>>, vector<16x128xf32>,
    return
  }
  func.func @transform_0(%arg0: i32) -> (i32, i32) {
    %c0_i32 = arith.constant 0 : i32
    %c0_i32_0 = arith.constant 0 : i32
    %c0_i32_1 = arith.constant 0 : i32
    return %c0_i32, %c0_i32_0 : i32, i32
  }
  func.func @transform_1(%arg0: i32) -> (i32, i32) {
    %c0_i32 = arith.constant 0 : i32
    %c0_i32_0 = arith.constant 0 : i32
    return %c0_i32, %arg0 : i32, i32
  }
  func.func @transform_2(%arg0: i32) -> (i32, i32) {
    %c0_i32 = arith.constant 0 : i32
    %c0_i32_0 = arith.constant 0 : i32
    %c0_i32_1 = arith.constant 0 : i32
    return %c0_i32, %c0_i32_0 : i32, i32
  }
  func.func @transform_3(%arg0: i32) -> (i32, i32) {
    %c0_i32 = arith.constant 0 : i32
    %c0_i32_0 = arith.constant 0 : i32
    return %c0_i32, %arg0 : i32, i32
  }
}

module attributes {stable_mosaic.version = 11 : i64} {
  func.func @_matmul_act_kernel(%arg0: i32, %arg1: memref<16x144xbf16, #tpu.memory_space<vmem>>, %arg2: memref<144x128xbf16, #tpu.memory_space<vmem>>, %arg3: memref<16x1xf32, #tpu.memory_space<vmem>>, %arg4: memref<16x128xf32, #tpu.memory_space<vmem>>) attributes {dimension_semantics = [#tpu.dimension_semantics<parallel>], iteration_bounds = array<i64: 1>, scalar_prefetch = 0 : i64, scratch_operands = 0 : i64, tpu.core_type = #tpu.core_type<tc>, window_params = [{pipeline_mode = #tpu.pipeline_mode<synchronous>, transform_indices = @transform_0, window_bounds = array<i64: 16, 144>}, {transform_indices = @transform_1, window_bounds = array<i64: 144, 128>}, {pipeline_mode = #tpu.pipeline_mode<synchronous>, transform_indices = @transform_2, window_bounds = array<i64: 16, 1>}, {transform_indices = @transform_3, window_bounds = array<i64: 16, 128>}]} {
    %c0 = arith.constant 0 : index
    %c0_0 = arith.constant 0 : index
    %0 = vector.load %arg1[%c0, %c0_0] : memref<16x144xbf16, #tpu.memory_space<vmem>>, vector<16x144xbf16>
    %c0_1 = arith.constant 0 : index
    %c0_2 = arith.constant 0 : index
    %1 = vector.load %arg2[%c0_1, %c0_2] : memref<144x128xbf16, #tpu.memory_space<vmem>>, vector<144x128xbf16>
    %cst = arith.constant dense<0.000000e+00> : vector<16x128xf32>
    %2 = tpu.matmul %0, %1, %cst {dimension_numbers = #tpu.dot_dimension_numbers<[1], [0], [0], [1], [0, 0, 1, 1], [], []>} : vector<16x144xbf16>, vector<144x128xbf16>, vector<16x128xf32> -> vector<16x128xf32>
    %c0_3 = arith.constant 0 : index
    %c0_4 = arith.constant 0 : index
    %3 = vector.load %arg3[%c0_3, %c0_4] : memref<16x1xf32, #tpu.memory_space<vmem>>, vector<16x1xf32>
    %4 = vector.broadcast %3 : vector<16x1xf32> to vector<16x128xf32>
    %5 = arith.addf %2, %4 : vector<16x128xf32>
    %cst_5 = arith.constant 3.000000e+00 : f32
    %6 = vector.broadcast %cst_5 : f32 to vector<16x128xf32>
    %7 = arith.addf %5, %6 : vector<16x128xf32>
    %cst_6 = arith.constant 0.000000e+00 : f32
    %cst_7 = arith.constant 6.000000e+00 : f32
    %8 = vector.broadcast %cst_6 : f32 to vector<16x128xf32>
    %9 = arith.maximumf %8, %7 : vector<16x128xf32>
    %10 = vector.broadcast %cst_7 : f32 to vector<16x128xf32>
    %11 = arith.minimumf %10, %9 : vector<16x128xf32>
    %12 = arith.mulf %5, %11 : vector<16x128xf32>
    %cst_8 = arith.constant 0.166666672 : f32
    %13 = vector.broadcast %cst_8 : f32 to vector<16x128xf32>
    %14 = arith.mulf %12, %13 : vector<16x128xf32>
    %c0_9 = arith.constant 0 : index
    %c0_10 = arith.constant 0 : index
    %15 = vector.load %arg4[%c0_9, %c0_10] : memref<16x128xf32, #tpu.memory_space<vmem>>, vector<16x128xf32>
    tpu.vector_store %arg4[%c0_9, %c0_10], %14 {strides = array<i32>} : memref<16x128xf32, #tpu.memory_space<vmem>>, vector<16x128xf32>,
    return
  }
  func.func @transform_0(%arg0: i32) -> (i32, i32) {
    %c0_i32 = arith.constant 0 : i32
    %c0_i32_0 = arith.constant 0 : i32
    %c0_i32_1 = arith.constant 0 : i32
    return %c0_i32, %c0_i32_0 : i32, i32
  }
  func.func @transform_1(%arg0: i32) -> (i32, i32) {
    %c0_i32 = arith.constant 0 : i32
    %c0_i32_0 = arith.constant 0 : i32
    return %c0_i32, %arg0 : i32, i32
  }
  func.func @transform_2(%arg0: i32) -> (i32, i32) {
    %c0_i32 = arith.constant 0 : i32
    %c0_i32_0 = arith.constant 0 : i32
    %c0_i32_1 = arith.constant 0 : i32
    return %c0_i32, %c0_i32_0 : i32, i32
  }
  func.func @transform_3(%arg0: i32) -> (i32, i32) {
    %c0_i32 = arith.constant 0 : i32
    %c0_i32_0 = arith.constant 0 : i32
    return %c0_i32, %arg0 : i32, i32
  }
}

module attributes {stable_mosaic.version = 11 : i64} {
  func.func @_matmul_act_kernel(%arg0: i32, %arg1: memref<32x144xbf16, #tpu.memory_space<vmem>>, %arg2: memref<144x128xbf16, #tpu.memory_space<vmem>>, %arg3: memref<32x1xf32, #tpu.memory_space<vmem>>, %arg4: memref<32x128xf32, #tpu.memory_space<vmem>>) attributes {dimension_semantics = [#tpu.dimension_semantics<parallel>], iteration_bounds = array<i64: 1>, scalar_prefetch = 0 : i64, scratch_operands = 0 : i64, tpu.core_type = #tpu.core_type<tc>, window_params = [{pipeline_mode = #tpu.pipeline_mode<synchronous>, transform_indices = @transform_0, window_bounds = array<i64: 32, 144>}, {transform_indices = @transform_1, window_bounds = array<i64: 144, 128>}, {pipeline_mode = #tpu.pipeline_mode<synchronous>, transform_indices = @transform_2, window_bounds = array<i64: 32, 1>}, {transform_indices = @transform_3, window_bounds = array<i64: 32, 128>}]} {
    %c0 = arith.constant 0 : index
    %c0_0 = arith.constant 0 : index
    %0 = vector.load %arg1[%c0, %c0_0] : memref<32x144xbf16, #tpu.memory_space<vmem>>, vector<32x144xbf16>
    %c0_1 = arith.constant 0 : index
    %c0_2 = arith.constant 0 : index
    %1 = vector.load %arg2[%c0_1, %c0_2] : memref<144x128xbf16, #tpu.memory_space<vmem>>, vector<144x128xbf16>
    %cst = arith.constant dense<0.000000e+00> : vector<32x128xf32>
    %2 = tpu.matmul %0, %1, %cst {dimension_numbers = #tpu.dot_dimension_numbers<[1], [0], [0], [1], [0, 0, 1, 1], [], []>} : vector<32x144xbf16>, vector<144x128xbf16>, vector<32x128xf32> -> vector<32x128xf32>
    %c0_3 = arith.constant 0 : index
    %c0_4 = arith.constant 0 : index
    %3 = vector.load %arg3[%c0_3, %c0_4] : memref<32x1xf32, #tpu.memory_space<vmem>>, vector<32x1xf32>
    %4 = vector.broadcast %3 : vector<32x1xf32> to vector<32x128xf32>
    %5 = arith.addf %2, %4 : vector<32x128xf32>
    %cst_5 = arith.constant 3.000000e+00 : f32
    %6 = vector.broadcast %cst_5 : f32 to vector<32x128xf32>
    %7 = arith.addf %5, %6 : vector<32x128xf32>
    %cst_6 = arith.constant 0.000000e+00 : f32
    %cst_7 = arith.constant 6.000000e+00 : f32
    %8 = vector.broadcast %cst_6 : f32 to vector<32x128xf32>
    %9 = arith.maximumf %8, %7 : vector<32x128xf32>
    %10 = vector.broadcast %cst_7 : f32 to vector<32x128xf32>
    %11 = arith.minimumf %10, %9 : vector<32x128xf32>
    %12 = arith.mulf %5, %11 : vector<32x128xf32>
    %cst_8 = arith.constant 0.166666672 : f32
    %13 = vector.broadcast %cst_8 : f32 to vector<32x128xf32>
    %14 = arith.mulf %12, %13 : vector<32x128xf32>
    %c0_9 = arith.constant 0 : index
    %c0_10 = arith.constant 0 : index
    %15 = vector.load %arg4[%c0_9, %c0_10] : memref<32x128xf32, #tpu.memory_space<vmem>>, vector<32x128xf32>
    tpu.vector_store %arg4[%c0_9, %c0_10], %14 {strides = array<i32>} : memref<32x128xf32, #tpu.memory_space<vmem>>, vector<32x128xf32>,
    return
  }
  func.func @transform_0(%arg0: i32) -> (i32, i32) {
    %c0_i32 = arith.constant 0 : i32
    %c0_i32_0 = arith.constant 0 : i32
    %c0_i32_1 = arith.constant 0 : i32
    return %c0_i32, %c0_i32_0 : i32, i32
  }
  func.func @transform_1(%arg0: i32) -> (i32, i32) {
    %c0_i32 = arith.constant 0 : i32
    %c0_i32_0 = arith.constant 0 : i32
    return %c0_i32, %arg0 : i32, i32
  }
  func.func @transform_2(%arg0: i32) -> (i32, i32) {
    %c0_i32 = arith.constant 0 : i32
    %c0_i32_0 = arith.constant 0 : i32
    %c0_i32_1 = arith.constant 0 : i32
    return %c0_i32, %c0_i32_0 : i32, i32
  }
  func.func @transform_3(%arg0: i32) -> (i32, i32) {
    %c0_i32 = arith.constant 0 : i32
    %c0_i32_0 = arith.constant 0 : i32
    return %c0_i32, %arg0 : i32, i32
  }
}

module attributes {stable_mosaic.version = 11 : i64} {
  func.func @_matmul_act_kernel(%arg0: i32, %arg1: memref<40x432xbf16, #tpu.memory_space<vmem>>, %arg2: memref<432x128xbf16, #tpu.memory_space<vmem>>, %arg3: memref<40x1xf32, #tpu.memory_space<vmem>>, %arg4: memref<40x128xf32, #tpu.memory_space<vmem>>) attributes {dimension_semantics = [#tpu.dimension_semantics<parallel>], iteration_bounds = array<i64: 1>, scalar_prefetch = 0 : i64, scratch_operands = 0 : i64, tpu.core_type = #tpu.core_type<tc>, window_params = [{pipeline_mode = #tpu.pipeline_mode<synchronous>, transform_indices = @transform_0, window_bounds = array<i64: 40, 432>}, {transform_indices = @transform_1, window_bounds = array<i64: 432, 128>}, {pipeline_mode = #tpu.pipeline_mode<synchronous>, transform_indices = @transform_2, window_bounds = array<i64: 40, 1>}, {transform_indices = @transform_3, window_bounds = array<i64: 40, 128>}]} {
    %c0 = arith.constant 0 : index
    %c0_0 = arith.constant 0 : index
    %0 = vector.load %arg1[%c0, %c0_0] : memref<40x432xbf16, #tpu.memory_space<vmem>>, vector<40x432xbf16>
    %c0_1 = arith.constant 0 : index
    %c0_2 = arith.constant 0 : index
    %1 = vector.load %arg2[%c0_1, %c0_2] : memref<432x128xbf16, #tpu.memory_space<vmem>>, vector<432x128xbf16>
    %cst = arith.constant dense<0.000000e+00> : vector<40x128xf32>
    %2 = tpu.matmul %0, %1, %cst {dimension_numbers = #tpu.dot_dimension_numbers<[1], [0], [0], [1], [0, 0, 1, 1], [], []>} : vector<40x432xbf16>, vector<432x128xbf16>, vector<40x128xf32> -> vector<40x128xf32>
    %c0_3 = arith.constant 0 : index
    %c0_4 = arith.constant 0 : index
    %3 = vector.load %arg3[%c0_3, %c0_4] : memref<40x1xf32, #tpu.memory_space<vmem>>, vector<40x1xf32>
    %4 = vector.broadcast %3 : vector<40x1xf32> to vector<40x128xf32>
    %5 = arith.addf %2, %4 : vector<40x128xf32>
    %6 = tpu.iota {dimensions = array<i32: 0>} : vector<40x128xi32>
    %cst_5 = arith.constant 3.000000e+00 : f32
    %7 = vector.broadcast %cst_5 : f32 to vector<40x128xf32>
    %8 = arith.addf %5, %7 : vector<40x128xf32>
    %cst_6 = arith.constant 0.000000e+00 : f32
    %cst_7 = arith.constant 6.000000e+00 : f32
    %9 = vector.broadcast %cst_6 : f32 to vector<40x128xf32>
    %10 = arith.maximumf %9, %8 : vector<40x128xf32>
    %11 = vector.broadcast %cst_7 : f32 to vector<40x128xf32>
    %12 = arith.minimumf %11, %10 : vector<40x128xf32>
    %13 = arith.mulf %5, %12 : vector<40x128xf32>
    %cst_8 = arith.constant 0.166666672 : f32
    %14 = vector.broadcast %cst_8 : f32 to vector<40x128xf32>
    %15 = arith.mulf %13, %14 : vector<40x128xf32>
    %c16_i32 = arith.constant 16 : i32
    %16 = vector.broadcast %c16_i32 : i32 to vector<40x128xi32>
    %17 = arith.cmpi slt, %6, %16 : vector<40x128xi32>
    %18 = arith.select %17, %15, %5 : vector<40x128xi1>, vector<40x128xf32>
    %c0_9 = arith.constant 0 : index
    %c0_10 = arith.constant 0 : index
    %19 = vector.load %arg4[%c0_9, %c0_10] : memref<40x128xf32, #tpu.memory_space<vmem>>, vector<40x128xf32>
    tpu.vector_store %arg4[%c0_9, %c0_10], %18 {strides = array<i32>} : memref<40x128xf32, #tpu.memory_space<vmem>>, vector<40x128xf32>,
    return
  }
  func.func @transform_0(%arg0: i32) -> (i32, i32) {
    %c0_i32 = arith.constant 0 : i32
    %c0_i32_0 = arith.constant 0 : i32
    %c0_i32_1 = arith.constant 0 : i32
    return %c0_i32, %c0_i32_0 : i32, i32
  }
  func.func @transform_1(%arg0: i32) -> (i32, i32) {
    %c0_i32 = arith.constant 0 : i32
    %c0_i32_0 = arith.constant 0 : i32
    return %c0_i32, %arg0 : i32, i32
  }
  func.func @transform_2(%arg0: i32) -> (i32, i32) {
    %c0_i32 = arith.constant 0 : i32
    %c0_i32_0 = arith.constant 0 : i32
    %c0_i32_1 = arith.constant 0 : i32
    return %c0_i32, %c0_i32_0 : i32, i32
  }
  func.func @transform_3(%arg0: i32) -> (i32, i32) {
    %c0_i32 = arith.constant 0 : i32
    %c0_i32_0 = arith.constant 0 : i32
    return %c0_i32, %arg0 : i32, i32
  }
}

module attributes {stable_mosaic.version = 11 : i64} {
  func.func @_matmul_act_kernel(%arg0: i32, %arg1: memref<8x144xbf16, #tpu.memory_space<vmem>>, %arg2: memref<144x512xbf16, #tpu.memory_space<vmem>>, %arg3: memref<8x1xf32, #tpu.memory_space<vmem>>, %arg4: memref<8x512xf32, #tpu.memory_space<vmem>>) attributes {dimension_semantics = [#tpu.dimension_semantics<parallel>], iteration_bounds = array<i64: 1>, scalar_prefetch = 0 : i64, scratch_operands = 0 : i64, tpu.core_type = #tpu.core_type<tc>, window_params = [{pipeline_mode = #tpu.pipeline_mode<synchronous>, transform_indices = @transform_0, window_bounds = array<i64: 8, 144>}, {transform_indices = @transform_1, window_bounds = array<i64: 144, 512>}, {pipeline_mode = #tpu.pipeline_mode<synchronous>, transform_indices = @transform_2, window_bounds = array<i64: 8, 1>}, {transform_indices = @transform_3, window_bounds = array<i64: 8, 512>}]} {
    %c0 = arith.constant 0 : index
    %c0_0 = arith.constant 0 : index
    %0 = vector.load %arg1[%c0, %c0_0] : memref<8x144xbf16, #tpu.memory_space<vmem>>, vector<8x144xbf16>
    %c0_1 = arith.constant 0 : index
    %c0_2 = arith.constant 0 : index
    %1 = vector.load %arg2[%c0_1, %c0_2] : memref<144x512xbf16, #tpu.memory_space<vmem>>, vector<144x512xbf16>
    %cst = arith.constant dense<0.000000e+00> : vector<8x512xf32>
    %2 = tpu.matmul %0, %1, %cst {dimension_numbers = #tpu.dot_dimension_numbers<[1], [0], [0], [1], [0, 0, 1, 1], [], []>} : vector<8x144xbf16>, vector<144x512xbf16>, vector<8x512xf32> -> vector<8x512xf32>
    %c0_3 = arith.constant 0 : index
    %c0_4 = arith.constant 0 : index
    %3 = vector.load %arg3[%c0_3, %c0_4] : memref<8x1xf32, #tpu.memory_space<vmem>>, vector<8x1xf32>
    %4 = vector.broadcast %3 : vector<8x1xf32> to vector<8x512xf32>
    %5 = arith.addf %2, %4 : vector<8x512xf32>
    %cst_5 = arith.constant 0.000000e+00 : f32
    %6 = vector.broadcast %cst_5 : f32 to vector<8x512xf32>
    %7 = arith.subf %6, %5 : vector<8x512xf32>
    %8 = math.exp %7 : vector<8x512xf32>
    %cst_6 = arith.constant 1.000000e+00 : f32
    %9 = vector.broadcast %cst_6 : f32 to vector<8x512xf32>
    %10 = arith.addf %9, %8 : vector<8x512xf32>
    %11 = tpu.reciprocal %10 {approx = true} : vector<8x512xf32> -> vector<8x512xf32>
    %c0_7 = arith.constant 0 : index
    %c0_8 = arith.constant 0 : index
    %12 = vector.load %arg4[%c0_7, %c0_8] : memref<8x512xf32, #tpu.memory_space<vmem>>, vector<8x512xf32>
    tpu.vector_store %arg4[%c0_7, %c0_8], %11 {strides = array<i32>} : memref<8x512xf32, #tpu.memory_space<vmem>>, vector<8x512xf32>,
    return
  }
  func.func @transform_0(%arg0: i32) -> (i32, i32) {
    %c0_i32 = arith.constant 0 : i32
    %c0_i32_0 = arith.constant 0 : i32
    %c0_i32_1 = arith.constant 0 : i32
    return %c0_i32, %c0_i32_0 : i32, i32
  }
  func.func @transform_1(%arg0: i32) -> (i32, i32) {
    %c0_i32 = arith.constant 0 : i32
    %c0_i32_0 = arith.constant 0 : i32
    return %c0_i32, %arg0 : i32, i32
  }
  func.func @transform_2(%arg0: i32) -> (i32, i32) {
    %c0_i32 = arith.constant 0 : i32
    %c0_i32_0 = arith.constant 0 : i32
    %c0_i32_1 = arith.constant 0 : i32
    return %c0_i32, %c0_i32_0 : i32, i32
  }
  func.func @transform_3(%arg0: i32) -> (i32, i32) {
    %c0_i32 = arith.constant 0 : i32
    %c0_i32_0 = arith.constant 0 : i32
    return %c0_i32, %arg0 : i32, i32
  }
}

</mosaic_0001>

<bundles_post_ra>
// kernel: _lambda_.6
= control target key start
LH: loop header
LB: loop body
LE: loop exit
PB: predicated region body
PF: predicated region fallthrough
CT: control target
= control target key end

     0   :  { %v208_v1 = vmov 0   ;;  %vm70_vm0 = vcmask 261120   ;;  %s271_s1 = inlined_call_operand.vmem [shape: bf16[32,512], index: 1, kind: input, shape index: {}]   ;;  %s272_s2 = inlined_call_operand.vmem [shape: f32[8,1], index: 2, kind: input, shape index: {}]   ;;  %s273_s0 = inlined_call_operand.vmem [shape: bf16[8,32], index: 0, kind: input, shape index: {}]   ;;  %s274_s3 = inlined_call_operand.vmem [shape: f32[8,512], index: 3, kind: output, shape index: {}]  }
   0x1   :  { %v196_v0 = vld [vmem:[%s271_s1 + $0x4] ss:$16 sps:$4 sm:$0xff]   ;;  %106 = vmatprep.mubr.bf16.mxu0 %v208_v1  ;;  %147 = vmatprep.mubr.bf16.mxu1 %v208_v1  ;;  %v198_v2 = vld [vmem:[%s271_s1 + $0xc] ss:$16 sps:$4 sm:$0xff]   ;;  %v200_v3 = vld [vmem:[%s271_s1] ss:$16 sps:$4 sm:$0xff]  }
   0x2   :  { %195 = vset.pattern.permute.xlu0 %v208_v1  ;;  %74 = vmatprep.subr.bf16.mxu0 %v196_v0  ;;  %v201_v4 = vld [vmem:[%s271_s1 + $0x8] ss:$16 sps:$4 sm:$0xff]   ;;  %v202_v5 = vld [vmem:[%s271_s1 + $0x24] ss:$16 sps:$4 sm:$0xff]   ;;  %v204_v6 = vld [vmem:[%s271_s1 + $0x2c] ss:$16 sps:$4 sm:$0xff]  }
   0x3   :  { %115 = vmatprep.subr.bf16.mxu1 %v198_v2  ;;  %75 = vmatpush1.bf16.msra.mxu0 %v200_v3  ;;  %v206_v7 = vld [vmem:[%s271_s1 + $0x20] ss:$16 sps:$4 sm:$0xff]   ;;  %v207_v8 = vld [vmem:[%s271_s1 + $0x28] ss:$16 sps:$4 sm:$0xff]  }
   0x4   :  { %116 = vmatpush1.bf16.msra.mxu1 %v201_v4  ;;  %76 = vmatprep.subr.bf16.mxu0 %v202_v5  ;;  %v24_v9 = vld [vmem:[%s272_s2] sm:$0xff] }
   0x5   :  { %117 = vmatprep.subr.bf16.mxu1 %v204_v6  ;;  %27 = vperm.xlu0 %195, %v24_v9   ;;  %v15_v10 = vld [vmem:[%s273_s0] sm:$0xf] }
   0x7   :  { %77 = vmatpush1.bf16.msra.mxu0 %v206_v7 }
   0x8   :  { %118 = vmatpush1.bf16.msra.mxu1 %v207_v8 }
   0xa   :  { %192 = vmatmul.mubr.msk.bf16.vlgmr.msra.gmra.mrb[0].mxu0 %vm70_vm0, %v15_v10 }
   0xb   :  { %193 = vmatmul.mubr.msk.bf16.vlgmr.msra.gmra.mrb[0].mxu1 %vm70_vm0, %v15_v10 }
  0x84   :  { %v28_v11 = vpop.permute.xlu0 %27 }
  0xdd   :  { %v108_v12 = vpop.f32.mrb[0].mxu0 }
  0xde   :  { %v149_v13 = vpop.f32.mrb[0].mxu1  ;;  %v109_v14 = vadd.f32 %v108_v12, %v28_v11  ;;  %v110_v16 = vpop.f32.mrb[1].mxu0 }
  0xdf   :  { %v150_v15 = vadd.f32 %v149_v13, %v28_v11  ;;  %v151_v17 = vpop.f32.mrb[1].mxu1  ;;  %v111_v18 = vadd.f32 %v110_v16, %v28_v11  ;;  %v112_v20 = vpop.f32.mrb[2].mxu0 }
  0xe0   :  { %v152_v19 = vadd.f32 %v151_v17, %v28_v11  ;;  %v153_v21 = vpop.f32.mrb[2].mxu1  ;;  %v156_v22 = vadd.f32 3.0, %v109_v14  ;;  %v113_v24 = vpop.f32.mrb[3].mxu0 }
  0xe1   :  { %v158_v23 = vadd.f32 3.0, %v150_v15  ;;  %v154_v25 = vpop.f32.mrb[3].mxu1  ;;  %v157_v26 = vadd.f32 3.0, %v111_v18 }
  0xe2   :  { %v159_v27 = vadd.f32 3.0, %v152_v19  ;;  %v160_v28 = vmax.f32 %v156_v22, 0.0 }
  0xe3   :  { %v162_v29 = vmax.f32 %v158_v23, 0.0  ;;  %v161_v30 = vmax.f32 %v157_v26, 0.0 }
  0xe4   :  { %v163_v31 = vmax.f32 %v159_v27, 0.0  ;;  %v164_v32 = vmin.f32 %v160_v28, 6.0 }
  0xe5   :  { %v166_v33 = vmin.f32 %v162_v29, 6.0  ;;  %v165_v34 = vmin.f32 %v161_v30, 6.0 }
  0xe6   :  { %v167_v35 = vmin.f32 %v163_v31, 6.0  ;;  %v168_v36 = vmul.f32 %v164_v32, %v109_v14 }
  0xe7   :  { %v170_v37 = vmul.f32 %v166_v33, %v150_v15  ;;  %v169_v38 = vmul.f32 %v165_v34, %v111_v18 }
  0xe8   :  { %v171_v39 = vmul.f32 %v167_v35, %v152_v19  ;;  %v172_v40 = vmul.f32 0.16666667, %v168_v36 }
  0xe9   :  { %v174_v41 = vmul.f32 0.16666667, %v170_v37  ;;  %v173_v42 = vmul.f32 0.16666667, %v169_v38 }
  0xea   :  { %v175_v43 = vmul.f32 0.16666667, %v171_v39  ;;  %176 = vst [vmem:[%s274_s3] sm:$0xff] %v172_v40 }
  0xeb   :  { %178 = vst [vmem:[%s274_s3 + $0x10] sm:$0xff] %v174_v41  ;;  %177 = vst [vmem:[%s274_s3 + $0x8] sm:$0xff] %v173_v42 }
  0xec   :  { %179 = vst [vmem:[%s274_s3 + $0x18] sm:$0xff] %v175_v43 }

// kernel: _lambda_.7
= control target key start
LH: loop header
LB: loop body
LE: loop exit
PB: predicated region body
PF: predicated region fallthrough
CT: control target
= control target key end

     0   :  { %v172_v0 = vmov 0.0   ;;  %vm173_vm0 = vmmov 0   ;;  %v174_v2 = vmov 0   ;;  %vm74_vm1 = vcmask 1043456   ;;  %s225_s1 = inlined_call_operand.vmem [shape: bf16[72,128], index: 1, kind: input, shape index: {}]   ;;  %s226_s2 = inlined_call_operand.vmem [shape: f32[16,1], index: 2, kind: input, shape index: {}]   ;;  %s227_s0 = inlined_call_operand.vmem [shape: bf16[16,72], index: 0, kind: input, shape index: {}]   ;;  %s228_s3 = inlined_call_operand.vmem [shape: f32[16,128], index: 3, kind: output, shape index: {}]  }
   0x1   :  { %148 = vmatprep.subr.bf16.mxu0 %v172_v0  ;;  %v166_v1 = vld [vmem:[%s225_s1] sm:$0xff]   ;;  %158 = vmatprep.mubr.msk.bf16.mxu0 %vm173_vm0, %v172_v0  ;;  %v167_v3 = vld [vmem:[%s225_s1 + $0x8] sm:$0xff]   ;;  %v168_v5 = vld [vmem:[%s225_s1 + $0x10] sm:$0xff]   ;;  %vm70_vm2 = vcmask 588800  }
   0x2   :  { %165 = vset.pattern.permute.xlu0 %v174_v2  ;;  %149 = vmatpush3.bf16.msra.mxu0 %v166_v1  ;;  %v26_v4 = vld [vmem:[%s226_s2] sm:$0xff]  ;;  %v27_v6 = vld [vmem:[%s226_s2 + $0x8] sm:$0xff]  ;;  %v169_v7 = vld [vmem:[%s225_s1 + $0x18] sm:$0xff]  }
   0x3   :  { %150 = vmatprep.subr.bf16.mxu0 %v172_v0  ;;  %30 = vperm.xlu0 %165, %v26_v4   ;;  %v170_v8 = vld [vmem:[%s225_s1 + $0x20] ss:$0 sps:$4 sm:$0xff]  }
   0x4   :  { %v76_v9 = vsel %vm74_vm1, %v170_v8, 0  ;;  %v171_v10 = vld [vmem:[%s227_s0] sm:$0xff]  }
   0x6   :  { %151 = vmatpush3.bf16.msra.mxu0 %v167_v3 }
   0x7   :  { %152 = vmatprep.subr.bf16.mxu0 %v172_v0  ;;  %35 = vperm.xlu0 %165, %v27_v6  }
   0xa   :  { %153 = vmatpush3.bf16.msra.mxu0 %v168_v5 }
   0xb   :  { %154 = vmatprep.subr.bf16.mxu0 %v172_v0 }
   0xe   :  { %155 = vmatpush3.bf16.msra.mxu0 %v169_v7 }
   0xf   :  { %156 = vmatprep.subr.bf16.mxu0 %v172_v0 }
  0x12   :  { %157 = vmatpush3.bf16.msra.mxu0 %v76_v9 }
  0x15   :  { %159 = vmatmul.mubr.msk.bf16.vlgmr.msra.gmra.mrb[0].mxu0 %vm70_vm2, %v171_v10 }
  0x82   :  { %v31_v11 = vpop.permute.xlu0 %30 }
  0x86   :  { %v36_v15 = vpop.permute.xlu0 %35 }
  0xe8   :  { %v112_v12 = vpop.f32.mrb[0].mxu0 }
  0xe9   :  { %v113_v13 = vadd.f32 %v112_v12, %v31_v11  ;;  %v160_v14 = vpop.f32.mrb[1].mxu0 }
  0xea   :  { %v115_v16 = vpop.f32.mrb[2].mxu0 }
  0xeb   :  { %v119_v17 = vadd.f32 3.0, %v113_v13  ;;  %v116_v18 = vadd.f32 %v115_v16, %v36_v15  ;;  %v161_v19 = vpop.f32.mrb[3].mxu0 }
  0xed   :  { %v121_v20 = vmax.f32 %v119_v17, 0.0  ;;  %v120_v21 = vadd.f32 3.0, %v116_v18 }
  0xef   :  { %v123_v22 = vmin.f32 %v121_v20, 6.0  ;;  %v122_v23 = vmax.f32 %v120_v21, 0.0 }
  0xf1   :  { %v125_v24 = vmul.f32 %v123_v22, %v113_v13  ;;  %v124_v25 = vmin.f32 %v122_v23, 6.0 }
  0xf3   :  { %v127_v26 = vmul.f32 0.16666667, %v125_v24  ;;  %v126_v27 = vmul.f32 %v124_v25, %v116_v18 }
  0xf5   :  { %129 = vst [vmem:[%s228_s3] sm:$0xff] %v127_v26  ;;  %v128_v28 = vmul.f32 0.16666667, %v126_v27 }
  0xf7   :  { %130 = vst [vmem:[%s228_s3 + $0x8] sm:$0xff] %v128_v28 }

// kernel: _lambda_.8
= control target key start
LH: loop header
LB: loop body
LE: loop exit
PB: predicated region body
PF: predicated region fallthrough
CT: control target
= control target key end

     0   :  { %v197_v0 = vmov 0   ;;  %vm110_vm0 = vcmask 130048   ;;  %s263_s1 = inlined_call_operand.vmem [shape: bf16[144,128], index: 1, kind: input, shape index: {}]   ;;  %s264_s0 = inlined_call_operand.vmem [shape: bf16[16,144], index: 0, kind: input, shape index: {}]   ;;  %s265_s2 = inlined_call_operand.vmem [shape: f32[16,1], index: 2, kind: input, shape index: {}]   ;;  %s266_s3 = inlined_call_operand.vmem [shape: f32[16,128], index: 3, kind: output, shape index: {}]  }
   0x1   :  { %114 = vmatprep.subr.bf16.mxu0 %v197_v0  ;;  %v185_v1 = vld [vmem:[%s263_s1] sm:$0xff]   ;;  %184 = vset.pattern.permute.xlu0 %v197_v0  ;;  %v186_v2 = vld [vmem:[%s263_s1 + $0x8] sm:$0xff]   ;;  %v187_v3 = vld [vmem:[%s263_s1 + $0x10] sm:$0xff]  }
   0x2   :  { %115 = vmatpush1.bf16.msra.mxu0 %v185_v1  ;;  %v188_v4 = vld [vmem:[%s263_s1 + $0x18] sm:$0xff]   ;;  %v196_v5 = vld [vmem:[%s264_s0 + $0x4] ss:$8 sps:$4 sm:$0xff]   ;;  %v191_v10 = vld [vmem:[%s263_s1 + $0x30] sm:$0xff]  }
   0x3   :  { %116 = vmatprep.subr.bf16.mxu0 %v197_v0  ;;  %v35_v6 = vld [vmem:[%s265_s2] sm:$0xff]  ;;  %182 = vmatprep.mubr.msk.bf16.mxu0 %vm110_vm0, %v196_v5  ;;  %v36_v7 = vld [vmem:[%s265_s2 + $0x8] sm:$0xff]  ;;  %v192_v11 = vld [vmem:[%s263_s1 + $0x38] sm:$0xff]  }
   0x4   :  { %39 = vperm.xlu0 %184, %v35_v6   ;;  %v189_v8 = vld [vmem:[%s263_s1 + $0x20] sm:$0xff]   ;;  %v190_v9 = vld [vmem:[%s263_s1 + $0x28] sm:$0xff]  }
   0x5   :  { %v193_v12 = vld [vmem:[%s263_s1 + $0x40] sm:$0xff]  }
   0x6   :  { %117 = vmatpush1.bf16.msra.mxu0 %v186_v2  ;;  %v194_v13 = vld [vmem:[%s264_s0] ss:$8 sps:$4 sm:$0xff]  }
   0x7   :  { %118 = vmatprep.subr.bf16.mxu0 %v197_v0 }
   0x8   :  { %44 = vperm.xlu0 %184, %v36_v7  }
   0xa   :  { %119 = vmatpush1.bf16.msra.mxu0 %v187_v3 }
   0xb   :  { %120 = vmatprep.subr.bf16.mxu0 %v197_v0 }
   0xe   :  { %121 = vmatpush1.bf16.msra.mxu0 %v188_v4 }
   0xf   :  { %122 = vmatprep.subr.bf16.mxu0 %v197_v0 }
  0x12   :  { %123 = vmatpush1.bf16.msra.mxu0 %v189_v8 }
  0x13   :  { %124 = vmatprep.subr.bf16.mxu0 %v197_v0 }
  0x16   :  { %125 = vmatpush1.bf16.msra.mxu0 %v190_v9 }
  0x17   :  { %126 = vmatprep.subr.bf16.mxu0 %v197_v0 }
  0x1a   :  { %127 = vmatpush1.bf16.msra.mxu0 %v191_v10 }
  0x1b   :  { %128 = vmatprep.subr.bf16.mxu0 %v197_v0 }
  0x1e   :  { %129 = vmatpush1.bf16.msra.mxu0 %v192_v11 }
  0x1f   :  { %130 = vmatprep.subr.bf16.mxu0 %v197_v0 }
  0x22   :  { %131 = vmatpush1.bf16.msra.mxu0 %v193_v12 }
  0x25   :  { %147 = vmatmul.mubr.bf16.vlgmr.msra.gmra.mrb[0].mxu0 %v194_v13 }
  0x83   :  { %v40_v14 = vpop.permute.xlu0 %39 }
  0x87   :  { %v45_v18 = vpop.permute.xlu0 %44 }
  0xf8   :  { %v148_v15 = vpop.f32.mrb[0].mxu0 }
  0xf9   :  { %v149_v16 = vadd.f32 %v148_v15, %v40_v14  ;;  %v150_v17 = vpop.f32.mrb[1].mxu0 }
  0xfa   :  { %v151_v19 = vpop.f32.mrb[2].mxu0 }
  0xfb   :  { %v155_v20 = vadd.f32 3.0, %v149_v16  ;;  %v152_v21 = vadd.f32 %v151_v19, %v45_v18  ;;  %v153_v22 = vpop.f32.mrb[3].mxu0 }
  0xfd   :  { %v157_v23 = vmax.f32 %v155_v20, 0.0  ;;  %v156_v24 = vadd.f32 3.0, %v152_v21 }
  0xff   :  { %v159_v25 = vmin.f32 %v157_v23, 6.0  ;;  %v158_v26 = vmax.f32 %v156_v24, 0.0 }
 0x101   :  { %v161_v27 = vmul.f32 %v159_v25, %v149_v16  ;;  %v160_v28 = vmin.f32 %v158_v26, 6.0 }
 0x103   :  { %v163_v29 = vmul.f32 0.16666667, %v161_v27  ;;  %v162_v30 = vmul.f32 %v160_v28, %v152_v21 }
 0x105   :  { %165 = vst [vmem:[%s266_s3] sm:$0xff] %v163_v29  ;;  %v164_v31 = vmul.f32 0.16666667, %v162_v30 }
 0x107   :  { %166 = vst [vmem:[%s266_s3 + $0x8] sm:$0xff] %v164_v31 }

// kernel: _lambda_.9
= control target key start
LH: loop header
LB: loop body
LE: loop exit
PB: predicated region body
PF: predicated region fallthrough
CT: control target
= control target key end

     0   :  { %v268_v0 = vmov 0   ;;  %vm133_vm0 = vcmask 130048   ;;  %s352_s1 = inlined_call_operand.vmem [shape: bf16[144,128], index: 1, kind: input, shape index: {}]   ;;  %s353_s0 = inlined_call_operand.vmem [shape: bf16[32,144], index: 0, kind: input, shape index: {}]   ;;  %s354_s2 = inlined_call_operand.vmem [shape: f32[32,1], index: 2, kind: input, shape index: {}]   ;;  %s355_s3 = inlined_call_operand.vmem [shape: f32[32,128], index: 3, kind: output, shape index: {}]  }
   0x1   :  { %140 = vmatprep.subr.bf16.mxu0 %v268_v0  ;;  %232 = vmatprep.subr.bf16.mxu1 %v268_v0  ;;  %v253_v1 = vld [vmem:[%s352_s1] sm:$0xff]   ;;  %v254_v2 = vld [vmem:[%s352_s1 + $0x8] sm:$0xff]   ;;  %v255_v3 = vld [vmem:[%s352_s1 + $0x10] sm:$0xff]  }
   0x2   :  { %252 = vset.pattern.permute.xlu1 %v268_v0  ;;  %251 = vset.pattern.permute.xlu0 %v268_v0  ;;  %v256_v4 = vld [vmem:[%s352_s1 + $0x18] sm:$0xff]   ;;  %v264_v5 = vld [vmem:[%s353_s0 + $0x4] ss:$8 sps:$4 sm:$0xff]   ;;  %v39_v7 = vld [vmem:[%s354_s2 + $0x10] sm:$0xff] }
   0x3   :  { %141 = vmatpush1.bf16.msra.mxu0 %v253_v1  ;;  %241 = vmatpush1.bf16.msra.mxu1 %v253_v1  ;;  %v267_v6 = vld [vmem:[%s353_s0 + $0x14] ss:$8 sps:$4 sm:$0xff]   ;;  %v37_v8 = vld [vmem:[%s354_s2] sm:$0xff]  ;;  %v38_v11 = vld [vmem:[%s354_s2 + $0x8] sm:$0xff] }
   0x4   :  { %142 = vmatprep.subr.bf16.mxu0 %v268_v0  ;;  %233 = vmatprep.subr.bf16.mxu1 %v268_v0  ;;  %v40_v9 = vld [vmem:[%s354_s2 + $0x18] sm:$0xff]  ;;  %v257_v10 = vld [vmem:[%s352_s1 + $0x20] sm:$0xff]   ;;  %v258_v12 = vld [vmem:[%s352_s1 + $0x28] sm:$0xff]  }
   0x5   :  { %230 = vmatprep.mubr.msk.bf16.mxu0 %vm133_vm0, %v264_v5  ;;  %53 = vperm.xlu1 %252, %v39_v7   ;;  %v259_v13 = vld [vmem:[%s352_s1 + $0x30] sm:$0xff]   ;;  %v260_v14 = vld [vmem:[%s352_s1 + $0x38] sm:$0xff]   ;;  %v261_v15 = vld [vmem:[%s352_s1 + $0x40] sm:$0xff]  }
   0x6   :  { %231 = vmatprep.mubr.msk.bf16.mxu1 %vm133_vm0, %v267_v6  ;;  %43 = vperm.xlu0 %251, %v37_v8   ;;  %v262_v16 = vld [vmem:[%s353_s0] ss:$8 sps:$4 sm:$0xff]   ;;  %v265_v17 = vld [vmem:[%s353_s0 + $0x10] ss:$8 sps:$4 sm:$0xff]  }
   0x7   :  { %143 = vmatpush1.bf16.msra.mxu0 %v254_v2  ;;  %242 = vmatpush1.bf16.msra.mxu1 %v254_v2 }
   0x8   :  { %144 = vmatprep.subr.bf16.mxu0 %v268_v0  ;;  %234 = vmatprep.subr.bf16.mxu1 %v268_v0 }
   0x9   :  { %58 = vperm.xlu1 %252, %v40_v9  }
   0xa   :  { %48 = vperm.xlu0 %251, %v38_v11  }
   0xb   :  { %145 = vmatpush1.bf16.msra.mxu0 %v255_v3  ;;  %243 = vmatpush1.bf16.msra.mxu1 %v255_v3 }
   0xc   :  { %146 = vmatprep.subr.bf16.mxu0 %v268_v0  ;;  %235 = vmatprep.subr.bf16.mxu1 %v268_v0 }
   0xf   :  { %147 = vmatpush1.bf16.msra.mxu0 %v256_v4  ;;  %244 = vmatpush1.bf16.msra.mxu1 %v256_v4 }
  0x10   :  { %148 = vmatprep.subr.bf16.mxu0 %v268_v0  ;;  %236 = vmatprep.subr.bf16.mxu1 %v268_v0 }
  0x13   :  { %149 = vmatpush1.bf16.msra.mxu0 %v257_v10  ;;  %245 = vmatpush1.bf16.msra.mxu1 %v257_v10 }
  0x14   :  { %150 = vmatprep.subr.bf16.mxu0 %v268_v0  ;;  %237 = vmatprep.subr.bf16.mxu1 %v268_v0 }
  0x17   :  { %151 = vmatpush1.bf16.msra.mxu0 %v258_v12  ;;  %246 = vmatpush1.bf16.msra.mxu1 %v258_v12 }
  0x18   :  { %152 = vmatprep.subr.bf16.mxu0 %v268_v0  ;;  %238 = vmatprep.subr.bf16.mxu1 %v268_v0 }
  0x1b   :  { %153 = vmatpush1.bf16.msra.mxu0 %v259_v13  ;;  %247 = vmatpush1.bf16.msra.mxu1 %v259_v13 }
  0x1c   :  { %154 = vmatprep.subr.bf16.mxu0 %v268_v0  ;;  %239 = vmatprep.subr.bf16.mxu1 %v268_v0 }
  0x1f   :  { %155 = vmatpush1.bf16.msra.mxu0 %v260_v14  ;;  %248 = vmatpush1.bf16.msra.mxu1 %v260_v14 }
  0x20   :  { %156 = vmatprep.subr.bf16.mxu0 %v268_v0  ;;  %240 = vmatprep.subr.bf16.mxu1 %v268_v0 }
  0x23   :  { %157 = vmatpush1.bf16.msra.mxu0 %v261_v15  ;;  %249 = vmatpush1.bf16.msra.mxu1 %v261_v15 }
  0x26   :  { %173 = vmatmul.mubr.bf16.vlgmr.msra.gmra.mrb[0].mxu0 %v262_v16  ;;  %181 = vmatmul.mubr.bf16.vlgmr.msra.gmra.mrb[0].mxu1 %v265_v17 }
  0x84   :  { %v54_v18 = vpop.permute.xlu1 %53 }
  0x85   :  { %v44_v19 = vpop.permute.xlu0 %43 }
  0x88   :  { %v59_v20 = vpop.permute.xlu1 %58 }
  0x89   :  { %v49_v21 = vpop.permute.xlu0 %48 }
  0xf9   :  { %v174_v22 = vpop.f32.mrb[0].mxu0  ;;  %v182_v23 = vpop.f32.mrb[0].mxu1 }
  0xfa   :  { %v175_v24 = vadd.f32 %v174_v22, %v44_v19  ;;  %v183_v25 = vadd.f32 %v182_v23, %v54_v18  ;;  %v176_v26 = vpop.f32.mrb[1].mxu0  ;;  %v184_v27 = vpop.f32.mrb[1].mxu1 }
  0xfb   :  { %v177_v28 = vpop.f32.mrb[2].mxu0  ;;  %v185_v29 = vpop.f32.mrb[2].mxu1 }
  0xfc   :  { %v189_v30 = vadd.f32 3.0, %v175_v24  ;;  %v191_v31 = vadd.f32 3.0, %v183_v25  ;;  %v178_v32 = vadd.f32 %v177_v28, %v49_v21  ;;  %v186_v33 = vadd.f32 %v185_v29, %v59_v20  ;;  %v179_v34 = vpop.f32.mrb[3].mxu0  ;;  %v187_v35 = vpop.f32.mrb[3].mxu1 }
  0xfe   :  { %v193_v36 = vmax.f32 %v189_v30, 0.0  ;;  %v195_v37 = vmax.f32 %v191_v31, 0.0  ;;  %v190_v38 = vadd.f32 3.0, %v178_v32  ;;  %v192_v39 = vadd.f32 3.0, %v186_v33 }
 0x100   :  { %v197_v40 = vmin.f32 %v193_v36, 6.0  ;;  %v199_v41 = vmin.f32 %v195_v37, 6.0  ;;  %v194_v42 = vmax.f32 %v190_v38, 0.0  ;;  %v196_v43 = vmax.f32 %v192_v39, 0.0 }
 0x102   :  { %v201_v44 = vmul.f32 %v197_v40, %v175_v24  ;;  %v203_v45 = vmul.f32 %v199_v41, %v183_v25  ;;  %v198_v46 = vmin.f32 %v194_v42, 6.0  ;;  %v200_v47 = vmin.f32 %v196_v43, 6.0 }
 0x104   :  { %v205_v48 = vmul.f32 0.16666667, %v201_v44  ;;  %v207_v49 = vmul.f32 0.16666667, %v203_v45  ;;  %v202_v50 = vmul.f32 %v198_v46, %v178_v32  ;;  %v204_v51 = vmul.f32 %v200_v47, %v186_v33 }
 0x106   :  { %209 = vst [vmem:[%s355_s3] sm:$0xff] %v205_v48  ;;  %211 = vst [vmem:[%s355_s3 + $0x10] sm:$0xff] %v207_v49  ;;  %v206_v52 = vmul.f32 0.16666667, %v202_v50  ;;  %v208_v53 = vmul.f32 0.16666667, %v204_v51 }
 0x108   :  { %210 = vst [vmem:[%s355_s3 + $0x8] sm:$0xff] %v206_v52  ;;  %212 = vst [vmem:[%s355_s3 + $0x18] sm:$0xff] %v208_v53 }

// kernel: _lambda_.10
= control target key start
LH: loop header
LB: loop body
LE: loop exit
PB: predicated region body
PF: predicated region fallthrough
CT: control target
= control target key end

     0   :  { %v616_v0 = vmov 0   ;;  %vm322_vm0 = vcmask 392192   ;;  %s794_s1 = inlined_call_operand.vmem [shape: bf16[432,128], index: 1, kind: input, shape index: {}]   ;;  %s795_s0 = inlined_call_operand.vmem [shape: bf16[40,432], index: 0, kind: input, shape index: {}]   ;;  %s796_s2 = inlined_call_operand.vmem [shape: f32[40,1], index: 2, kind: input, shape index: {}]   ;;  %s797_s3 = inlined_call_operand.vmem [shape: f32[40,128], index: 3, kind: output, shape index: {}]  }
   0x1   :  { %388 = vmatprep.subr.bf16.mxu1 %v616_v0  ;;  %v573_v1 = vld [vmem:[%s794_s1 + $0x40] sm:$0xff]   ;;  %571 = vset.pattern.permute.xlu0 %v616_v0  ;;  %v576_v4 = vld [vmem:[%s794_s1 + $0x48] sm:$0xff]   ;;  %v579_v7 = vld [vmem:[%s794_s1 + $0x50] sm:$0xff]  }
   0x2   :  { %v574_v2 = vld [vmem:[%s794_s1 + $0x80] sm:$0xff]   ;;  %572 = vset.pattern.permute.xlu1 %v616_v0  ;;  %536 = vmatprep.subr.bf16.mxu0 %v573_v1  ;;  %v577_v5 = vld [vmem:[%s794_s1 + $0x88] sm:$0xff]   ;;  %v580_v8 = vld [vmem:[%s794_s1 + $0x90] sm:$0xff]  }
   0x3   :  { %v575_v3 = vld [vmem:[%s794_s1] sm:$0xff]   ;;  %389 = vmatpush1.bf16.msra.mxu1 %v574_v2  ;;  %v578_v6 = vld [vmem:[%s794_s1 + $0x8] sm:$0xff]   ;;  %v581_v9 = vld [vmem:[%s794_s1 + $0x10] sm:$0xff]  }
   0x4   :  { %537 = vmatpush3.bf16.msra.mxu0 %v575_v3  ;;  %390 = vmatprep.subr.bf16.mxu1 %v616_v0  ;;  %v582_v10 = vld [vmem:[%s794_s1 + $0x58] sm:$0xff]   ;;  %v585_v13 = vld [vmem:[%s794_s1 + $0x60] sm:$0xff]   ;;  %v588_v16 = vld [vmem:[%s794_s1 + $0x68] sm:$0xff]  }
   0x5   :  { %538 = vmatprep.subr.bf16.mxu0 %v576_v4  ;;  %v583_v11 = vld [vmem:[%s794_s1 + $0x98] sm:$0xff]   ;;  %v586_v14 = vld [vmem:[%s794_s1 + $0xa0] sm:$0xff]   ;;  %v589_v17 = vld [vmem:[%s794_s1 + $0xa8] sm:$0xff]  }
   0x6   :  { %v584_v12 = vld [vmem:[%s794_s1 + $0x18] sm:$0xff]   ;;  %v587_v15 = vld [vmem:[%s794_s1 + $0x20] sm:$0xff]   ;;  %v590_v18 = vld [vmem:[%s794_s1 + $0x28] sm:$0xff]  }
   0x7   :  { %391 = vmatpush1.bf16.msra.mxu1 %v577_v5  ;;  %v591_v19 = vld [vmem:[%s794_s1 + $0x70] sm:$0xff]   ;;  %v594_v22 = vld [vmem:[%s794_s1 + $0x78] sm:$0xff]   ;;  %v600_v28 = vld [vmem:[%s794_s1 + $0xc0] sm:$0xff]  }
   0x8   :  { %539 = vmatpush3.bf16.msra.mxu0 %v578_v6  ;;  %392 = vmatprep.subr.bf16.mxu1 %v616_v0  ;;  %v592_v20 = vld [vmem:[%s794_s1 + $0xb0] sm:$0xff]   ;;  %v595_v24 = vld [vmem:[%s794_s1 + $0xb8] sm:$0xff]   ;;  %v79_v30 = vld [vmem:[%s796_s2] sm:$0xff] }
   0x9   :  { %540 = vmatprep.subr.bf16.mxu0 %v579_v7  ;;  %v593_v21 = vld [vmem:[%s794_s1 + $0x30] sm:$0xff]   ;;  %v596_v25 = vld [vmem:[%s794_s1 + $0x38] sm:$0xff]   ;;  %86 = vperm.xlu0 %571, %v79_v30   ;;  %v601_v32 = vld [vmem:[%s794_s1 + $0xc8] sm:$0xff]  }
   0xa   :  { %v599_v23 = vld [vmem:[%s795_s0 + $0x4] ss:$16 sps:$4 sm:$0xff]   ;;  %v597_v26 = vld [vmem:[%s795_s0] ss:$16 sps:$4 sm:$0xff]   ;;  %v608_v27 = vld [vmem:[%s795_s0 + $0xc] ss:$16 sps:$4 sm:$0xff]  }
   0xb   :  { %393 = vmatpush1.bf16.msra.mxu1 %v580_v8  ;;  %364 = vmatprep.mubr.bf16.mxu0 %v599_v23  ;;  %v602_v29 = vld [vmem:[%s795_s0 + $0x24] ss:$16 sps:$4 sm:$0xff]   ;;  %v80_v33 = vld [vmem:[%s796_s2 + $0x8] sm:$0xff]  ;;  %v82_v35 = vld [vmem:[%s796_s2 + $0x18] sm:$0xff] }
   0xc   :  { %541 = vmatpush3.bf16.msra.mxu0 %v581_v9  ;;  %394 = vmatprep.subr.bf16.mxu1 %v616_v0  ;;  %v81_v31 = vld [vmem:[%s796_s2 + $0x10] sm:$0xff]  ;;  %v23_v34 = vld [vmem:[%s795_s0 + $0x40] sm:$0xff]  ;;  %v606_v40 = vld [vmem:[%s795_s0 + $0x8] ss:$16 sps:$4 sm:$0xff]  }
   0xd   :  { %542 = vmatprep.subr.bf16.mxu0 %v582_v10  ;;  %533 = vmatprep.mubr.msk.bf16.mxu1 %vm322_vm0, %v608_v27  ;;  %v604_v36 = vld [vmem:[%s795_s0 + $0x20] ss:$16 sps:$4 sm:$0xff]   ;;  %v503_v39 = vcombine.high %v23_v34, %v23_v34  ;;  %v611_v41 = vld [vmem:[%s795_s0 + $0x2c] ss:$16 sps:$4 sm:$0xff]   ;;  %v502_v42 = vcombine.low %v23_v34, %v23_v34  ;;  %v613_v44 = vld [vmem:[%s795_s0 + $0x28] ss:$16 sps:$4 sm:$0xff]  }
   0xe   :  { %96 = vperm.xlu1 %572, %v81_v31   ;;  %91 = vperm.xlu0 %571, %v80_v33   ;;  %v605_v37 = vld [vmem:[%s794_s1 + $0xd0] sm:$0xff]   ;;  %v83_v38 = vld [vmem:[%s796_s2 + $0x20] sm:$0xff]  ;;  %v24_v43 = vld [vmem:[%s795_s0 + $0x48] sm:$0xff] }
   0xf   :  { %395 = vmatpush1.bf16.msra.mxu1 %v583_v11  ;;  %v505_v45 = vcombine.high %v24_v43, %v24_v43  ;;  %v504_v46 = vcombine.low %v24_v43, %v24_v43 }
  0x10   :  { %543 = vmatpush3.bf16.msra.mxu0 %v584_v12  ;;  %396 = vmatprep.subr.bf16.mxu1 %v616_v0 }
  0x11   :  { %544 = vmatprep.subr.bf16.mxu0 %v585_v13 }
  0x12   :  { %101 = vperm.xlu1 %572, %v82_v35   ;;  %106 = vperm.xlu0 %571, %v83_v38  }
  0x13   :  { %397 = vmatpush1.bf16.msra.mxu1 %v586_v14 }
  0x14   :  { %545 = vmatpush3.bf16.msra.mxu0 %v587_v15  ;;  %398 = vmatprep.subr.bf16.mxu1 %v616_v0 }
  0x15   :  { %546 = vmatprep.subr.bf16.mxu0 %v588_v16 }
  0x17   :  { %399 = vmatpush1.bf16.msra.mxu1 %v589_v17 }
  0x18   :  { %547 = vmatpush3.bf16.msra.mxu0 %v590_v18  ;;  %400 = vmatprep.subr.bf16.mxu1 %v616_v0 }
  0x19   :  { %548 = vmatprep.subr.bf16.mxu0 %v591_v19 }
  0x1b   :  { %401 = vmatpush1.bf16.msra.mxu1 %v592_v20 }
  0x1c   :  { %549 = vmatpush3.bf16.msra.mxu0 %v593_v21  ;;  %402 = vmatprep.subr.bf16.mxu1 %v616_v0 }
  0x1d   :  { %550 = vmatprep.subr.bf16.mxu0 %v594_v22 }
  0x1f   :  { %403 = vmatpush1.bf16.msra.mxu1 %v595_v24 }
  0x20   :  { %551 = vmatpush3.bf16.msra.mxu0 %v596_v25  ;;  %404 = vmatprep.subr.bf16.mxu1 %v616_v0 }
  0x23   :  { %365 = vmatmul.mubr.bf16.vlgmr.msra.gmra.mrb[0].mxu0 %v597_v26  ;;  %405 = vmatpush1.bf16.msra.mxu1 %v600_v28 }
  0x24   :  { %406 = vmatprep.subr.bf16.mxu1 %v616_v0  ;;  %372 = vmatprep.mubr.bf16.mxu0 %v602_v29 }
  0x27   :  { %407 = vmatpush1.bf16.msra.mxu1 %v601_v32 }
  0x28   :  { %408 = vmatprep.subr.bf16.mxu1 %v616_v0 }
  0x2b   :  { %373 = vmatmul.mubr.bf16.gmra.mrb[4].mxu0 %v604_v36  ;;  %409 = vmatpush1.bf16.msra.mxu1 %v605_v37 }
  0x2c   :  { %380 = vmatprep.mubr.bf16.mxu0 %v503_v39 }
  0x2e   :  { %421 = vmatmul.mubr.bf16.vlgmr.msra.gmra.mrb[0].mxu1 %v606_v40 }
  0x2f   :  { %534 = vmatprep.mubr.msk.bf16.mxu1 %vm322_vm0, %v611_v41 }
  0x33   :  { %381 = vmatmul.mubr.bf16.gmra.mrb[8].mxu0 %v502_v42 }
  0x36   :  { %429 = vmatmul.mubr.bf16.gmra.mrb[4].mxu1 %v613_v44 }
  0x37   :  { %535 = vmatprep.mubr.msk.bf16.mxu1 %vm322_vm0, %v505_v45 }
  0x3e   :  { %437 = vmatmul.mubr.bf16.gmra.mrb[8].mxu1 %v504_v46 }
  0x88   :  { %v87_v51 = vpop.permute.xlu0 %86 }
  0x8d   :  { %v92_v56 = vpop.permute.xlu0 %91  ;;  %v97_v58 = vpop.permute.xlu1 %96 }
  0x91   :  { %v102_v11 = vpop.permute.xlu1 %101  ;;  %v107_v30 = vpop.permute.xlu0 %106 }
  0xf6   :  { %v552_v47 = vpop.f32.mrb[0].mxu0 }
  0xf7   :  { %v553_v48 = vpop.f32.mrb[1].mxu0 }
  0xf8   :  { %v554_v49 = vadd.f32 %v553_v48, %v552_v47  ;;  %v555_v50 = vpop.f32.mrb[2].mxu0 }
  0xf9   :  { %v556_v52 = vpop.f32.mrb[3].mxu0 }
  0xfa   :  { %v557_v53 = vadd.f32 %v556_v52, %v555_v50  ;;  %v367_v55 = vadd.f32 %v554_v49, %v87_v51 }
  0xfc   :  { %v370_v63 = vadd.f32 %v557_v53, %v92_v56 }
  0xfe   :  { %v558_v54 = vpop.f32.mrb[4].mxu0 }
  0xff   :  { %v559_v57 = vpop.f32.mrb[5].mxu0 }
 0x100   :  { %v560_v59 = vadd.f32 %v559_v57, %v558_v54  ;;  %v561_v60 = vpop.f32.mrb[6].mxu0 }
 0x101   :  { %v422_v61 = vpop.f32.mrb[0].mxu1  ;;  %v562_v62 = vpop.f32.mrb[7].mxu0 }
 0x102   :  { %v423_v0 = vadd.f32 %v422_v61, %v367_v55  ;;  %v424_v1 = vpop.f32.mrb[1].mxu1  ;;  %v563_v2 = vadd.f32 %v562_v62, %v561_v60  ;;  %v375_v10 = vadd.f32 %v560_v59, %v97_v58 }
 0x103   :  { %v425_v3 = vpop.f32.mrb[2].mxu1 }
 0x104   :  { %v450_v4 = vadd.f32 3.0, %v423_v0  ;;  %v426_v5 = vadd.f32 %v425_v3, %v370_v63  ;;  %v427_v6 = vpop.f32.mrb[3].mxu1  ;;  %v378_v21 = vadd.f32 %v563_v2, %v102_v11 }
 0x106   :  { %v455_v7 = vmax.f32 %v450_v4, 0.0  ;;  %v451_v8 = vadd.f32 3.0, %v426_v5  ;;  %v564_v9 = vpop.f32.mrb[8].mxu0 }
 0x107   :  { %v565_v12 = vpop.f32.mrb[9].mxu0 }
 0x108   :  { %v460_v13 = vmin.f32 %v455_v7, 6.0  ;;  %v456_v14 = vmax.f32 %v451_v8, 0.0  ;;  %v566_v15 = vadd.f32 %v565_v12, %v564_v9  ;;  %v567_v16 = vpop.f32.mrb[10].mxu0 }
 0x109   :  { %v430_v17 = vpop.f32.mrb[4].mxu1  ;;  %v568_v18 = vpop.f32.mrb[11].mxu0 }
 0x10a   :  { %v465_v19 = vmul.f32 %v460_v13, %v423_v0  ;;  %v461_v20 = vmin.f32 %v456_v14, 6.0  ;;  %v431_v22 = vadd.f32 %v430_v17, %v375_v10  ;;  %v432_v23 = vpop.f32.mrb[5].mxu1  ;;  %v383_v31 = vadd.f32 %v566_v15, %v107_v30 }
 0x10b   :  { %v433_v24 = vpop.f32.mrb[6].mxu1 }
 0x10c   :  { %v470_v25 = vmul.f32 0.16666667, %v465_v19  ;;  %v466_v26 = vmul.f32 %v461_v20, %v426_v5  ;;  %487 = vst [vmem:[%s797_s3 + $0x10] sm:$0xff] %v431_v22  ;;  %v434_v27 = vadd.f32 %v433_v24, %v378_v21  ;;  %v435_v28 = vpop.f32.mrb[7].mxu1 }
 0x10e   :  { %485 = vst [vmem:[%s797_s3] sm:$0xff] %v470_v25  ;;  %v471_v29 = vmul.f32 0.16666667, %v466_v26  ;;  %488 = vst [vmem:[%s797_s3 + $0x18] sm:$0xff] %v434_v27 }
 0x110   :  { %486 = vst [vmem:[%s797_s3 + $0x8] sm:$0xff] %v471_v29 }
 0x111   :  { %v438_v32 = vpop.f32.mrb[8].mxu1 }
 0x112   :  { %v439_v33 = vadd.f32 %v438_v32, %v383_v31  ;;  %v440_v34 = vpop.f32.mrb[9].mxu1 }
 0x113   :  { %v441_v35 = vpop.f32.mrb[10].mxu1 }
 0x114   :  { %489 = vst [vmem:[%s797_s3 + $0x20] sm:$0xff] %v439_v33  ;;  %v442_v36 = vpop.f32.mrb[11].mxu1 }

// kernel: _lambda_.11
= control target key start
LH: loop header
LB: loop body
LE: loop exit
PB: predicated region body
PF: predicated region fallthrough
CT: control target
= control target key end

     0   :  { %v472_v1 = vmov 0   ;;  %vm244_vm0 = vcmask 130048   ;;  %s619_s1 = inlined_call_operand.vmem [shape: bf16[144,512], index: 1, kind: input, shape index: {}]   ;;  %s620_s0 = inlined_call_operand.vmem [shape: bf16[8,144], index: 0, kind: input, shape index: {}]   ;;  %s621_s2 = inlined_call_operand.vmem [shape: f32[8,1], index: 2, kind: input, shape index: {}]   ;;  %s622_s3 = inlined_call_operand.vmem [shape: f32[8,512], index: 3, kind: output, shape index: {}]  }
   0x1   :  { %v400_v0 = vld [vmem:[%s619_s1 + $0x4] ss:$16 sps:$4 sm:$0xff]   ;;  %399 = vset.pattern.permute.xlu0 %v472_v1  ;;  %v402_v2 = vld [vmem:[%s619_s1 + $0xc] ss:$16 sps:$4 sm:$0xff]   ;;  %v404_v3 = vld [vmem:[%s619_s1] ss:$16 sps:$4 sm:$0xff]  }
   0x2   :  { %248 = vmatprep.subr.bf16.mxu0 %v400_v0  ;;  %v405_v4 = vld [vmem:[%s619_s1 + $0x8] ss:$16 sps:$4 sm:$0xff]   ;;  %289 = vmatprep.subr.bf16.mxu1 %v402_v2  ;;  %v406_v5 = vld [vmem:[%s619_s1 + $0x24] ss:$16 sps:$4 sm:$0xff]   ;;  %v408_v6 = vld [vmem:[%s619_s1 + $0x2c] ss:$16 sps:$4 sm:$0xff]  }
   0x3   :  { %249 = vmatpush1.bf16.msra.mxu0 %v404_v3  ;;  %290 = vmatpush1.bf16.msra.mxu1 %v405_v4  ;;  %v410_v7 = vld [vmem:[%s619_s1 + $0x20] ss:$16 sps:$4 sm:$0xff]   ;;  %v411_v8 = vld [vmem:[%s619_s1 + $0x28] ss:$16 sps:$4 sm:$0xff]   ;;  %v412_v9 = vld [vmem:[%s619_s1 + $0x44] ss:$16 sps:$4 sm:$0xff]  }
   0x4   :  { %250 = vmatprep.subr.bf16.mxu0 %v406_v5  ;;  %291 = vmatprep.subr.bf16.mxu1 %v408_v6  ;;  %v414_v10 = vld [vmem:[%s619_s1 + $0x4c] ss:$16 sps:$4 sm:$0xff]   ;;  %v416_v11 = vld [vmem:[%s619_s1 + $0x40] ss:$16 sps:$4 sm:$0xff]   ;;  %v417_v12 = vld [vmem:[%s619_s1 + $0x48] ss:$16 sps:$4 sm:$0xff]  }
   0x5   :  { %v418_v13 = vld [vmem:[%s619_s1 + $0x64] ss:$16 sps:$4 sm:$0xff]   ;;  %v420_v14 = vld [vmem:[%s619_s1 + $0x6c] ss:$16 sps:$4 sm:$0xff]   ;;  %v422_v15 = vld [vmem:[%s619_s1 + $0x60] ss:$16 sps:$4 sm:$0xff]  }
   0x6   :  { %v423_v16 = vld [vmem:[%s619_s1 + $0x68] ss:$16 sps:$4 sm:$0xff]   ;;  %v424_v17 = vld [vmem:[%s619_s1 + $0x84] ss:$16 sps:$4 sm:$0xff]   ;;  %v426_v18 = vld [vmem:[%s619_s1 + $0x8c] ss:$16 sps:$4 sm:$0xff]  }
   0x7   :  { %251 = vmatpush1.bf16.msra.mxu0 %v410_v7  ;;  %292 = vmatpush1.bf16.msra.mxu1 %v411_v8  ;;  %v428_v19 = vld [vmem:[%s619_s1 + $0x80] ss:$16 sps:$4 sm:$0xff]   ;;  %v429_v20 = vld [vmem:[%s619_s1 + $0x88] ss:$16 sps:$4 sm:$0xff]   ;;  %v430_v21 = vld [vmem:[%s619_s1 + $0xa4] ss:$16 sps:$4 sm:$0xff]  }
   0x8   :  { %252 = vmatprep.subr.bf16.mxu0 %v412_v9  ;;  %293 = vmatprep.subr.bf16.mxu1 %v414_v10  ;;  %v432_v22 = vld [vmem:[%s619_s1 + $0xac] ss:$16 sps:$4 sm:$0xff]   ;;  %v434_v23 = vld [vmem:[%s619_s1 + $0xa0] ss:$16 sps:$4 sm:$0xff]   ;;  %v435_v24 = vld [vmem:[%s619_s1 + $0xa8] ss:$16 sps:$4 sm:$0xff]  }
   0x9   :  { %v436_v25 = vld [vmem:[%s619_s1 + $0xc4] ss:$16 sps:$4 sm:$0xff]   ;;  %v438_v26 = vld [vmem:[%s619_s1 + $0xcc] ss:$16 sps:$4 sm:$0xff]   ;;  %v440_v27 = vld [vmem:[%s619_s1 + $0xc0] ss:$16 sps:$4 sm:$0xff]  }
   0xa   :  { %v441_v28 = vld [vmem:[%s619_s1 + $0xc8] ss:$16 sps:$4 sm:$0xff]   ;;  %v15_v29 = vld [vmem:[%s620_s0] sm:$0xff]  ;;  %v444_v32 = vld [vmem:[%s619_s1 + $0xec] ss:$16 sps:$4 sm:$0xff]  }
   0xb   :  { %253 = vmatpush1.bf16.msra.mxu0 %v416_v11  ;;  %294 = vmatpush1.bf16.msra.mxu1 %v417_v12  ;;  %v52_v30 = vld [vmem:[%s621_s2] sm:$0xff]  ;;  %v359_v33 = vcombine.high %v15_v29, %v15_v29  ;;  %v447_v35 = vld [vmem:[%s619_s1 + $0xe8] ss:$16 sps:$4 sm:$0xff]   ;;  %v450_v37 = vld [vmem:[%s619_s1 + $0x10c] ss:$16 sps:$4 sm:$0xff]   ;;  %v358_v40 = vcombine.low %v15_v29, %v15_v29 }
   0xc   :  { %254 = vmatprep.subr.bf16.mxu0 %v418_v13  ;;  %295 = vmatprep.subr.bf16.mxu1 %v420_v14  ;;  %v442_v31 = vld [vmem:[%s619_s1 + $0xe4] ss:$16 sps:$4 sm:$0xff]   ;;  %v446_v34 = vld [vmem:[%s619_s1 + $0xe0] ss:$16 sps:$4 sm:$0xff]   ;;  %v453_v39 = vld [vmem:[%s619_s1 + $0x108] ss:$16 sps:$4 sm:$0xff]  }
   0xd   :  { %55 = vperm.xlu0 %399, %v52_v30   ;;  %396 = vmatprep.mubr.msk.bf16.mxu0 %vm244_vm0, %v359_v33  ;;  %v448_v36 = vld [vmem:[%s619_s1 + $0x104] ss:$16 sps:$4 sm:$0xff]   ;;  %v452_v38 = vld [vmem:[%s619_s1 + $0x100] ss:$16 sps:$4 sm:$0xff]  }
   0xe   :  { %397 = vmatprep.mubr.msk.bf16.mxu1 %vm244_vm0, %v359_v33 }
   0xf   :  { %255 = vmatpush1.bf16.msra.mxu0 %v422_v15  ;;  %296 = vmatpush1.bf16.msra.mxu1 %v423_v16 }
  0x10   :  { %256 = vmatprep.subr.bf16.mxu0 %v424_v17  ;;  %297 = vmatprep.subr.bf16.mxu1 %v426_v18 }
  0x13   :  { %257 = vmatpush1.bf16.msra.mxu0 %v428_v19  ;;  %298 = vmatpush1.bf16.msra.mxu1 %v429_v20 }
  0x14   :  { %258 = vmatprep.subr.bf16.mxu0 %v430_v21  ;;  %299 = vmatprep.subr.bf16.mxu1 %v432_v22 }
  0x17   :  { %259 = vmatpush1.bf16.msra.mxu0 %v434_v23  ;;  %300 = vmatpush1.bf16.msra.mxu1 %v435_v24 }
  0x18   :  { %260 = vmatprep.subr.bf16.mxu0 %v436_v25  ;;  %301 = vmatprep.subr.bf16.mxu1 %v438_v26 }
  0x1b   :  { %261 = vmatpush1.bf16.msra.mxu0 %v440_v27  ;;  %302 = vmatpush1.bf16.msra.mxu1 %v441_v28 }
  0x1c   :  { %262 = vmatprep.subr.bf16.mxu0 %v442_v31  ;;  %303 = vmatprep.subr.bf16.mxu1 %v444_v32 }
  0x1f   :  { %263 = vmatpush1.bf16.msra.mxu0 %v446_v34  ;;  %304 = vmatpush1.bf16.msra.mxu1 %v447_v35 }
  0x20   :  { %264 = vmatprep.subr.bf16.mxu0 %v448_v36  ;;  %305 = vmatprep.subr.bf16.mxu1 %v450_v37 }
  0x23   :  { %265 = vmatpush1.bf16.msra.mxu0 %v452_v38  ;;  %306 = vmatpush1.bf16.msra.mxu1 %v453_v39 }
  0x26   :  { %281 = vmatmul.mubr.bf16.vlgmr.msra.gmra.mrb[0].mxu0 %v358_v40  ;;  %322 = vmatmul.mubr.bf16.vlgmr.msra.gmra.mrb[0].mxu1 %v358_v40 }
  0x8c   :  { %v56_v41 = vpop.permute.xlu0 %55 }
  0xf9   :  { %v282_v42 = vpop.f32.mrb[0].mxu0  ;;  %v323_v43 = vpop.f32.mrb[0].mxu1 }
  0xfa   :  { %v283_v44 = vadd.f32 %v282_v42, %v56_v41  ;;  %v324_v45 = vadd.f32 %v323_v43, %v56_v41  ;;  %v284_v46 = vpop.f32.mrb[1].mxu0  ;;  %v325_v47 = vpop.f32.mrb[1].mxu1 }
  0xfb   :  { %v285_v48 = vadd.f32 %v284_v46, %v56_v41  ;;  %v326_v49 = vadd.f32 %v325_v47, %v56_v41  ;;  %v286_v50 = vpop.f32.mrb[2].mxu0  ;;  %v327_v51 = vpop.f32.mrb[2].mxu1 }
  0xfc   :  { %v330_v52 = vsub.f32 0.0, %v283_v44  ;;  %v332_v53 = vsub.f32 0.0, %v324_v45  ;;  %v287_v54 = vpop.f32.mrb[3].mxu0  ;;  %v328_v55 = vpop.f32.mrb[3].mxu1 }
  0xfd   :  { %v331_v56 = vsub.f32 0.0, %v285_v48  ;;  %v333_v57 = vsub.f32 0.0, %v326_v49 }
  0xfe   :  { %v334_v58 = vmul.f32 1.442695, %v330_v52  ;;  %v338_v59 = vmul.f32 1.442695, %v332_v53 }
  0xff   :  { %v336_v60 = vmul.f32 1.442695, %v331_v56  ;;  %v340_v61 = vmul.f32 1.442695, %v333_v57 }
 0x100   :  { %456 = vpow2.f32 %v334_v58 }
 0x101   :  { %458 = vpow2.f32 %v338_v59 }
 0x102   :  { %460 = vpow2.f32 %v336_v60 }
 0x103   :  { %462 = vpow2.f32 %v340_v61 }
 0x10a   :  { %v457_v62 = vpop.eup %456 }
 0x10b   :  { %v459_v63 = vpop.eup %458  ;;  %v342_v0 = vadd.f32 1.0, %v457_v62 }
 0x10c   :  { %v461_v1 = vpop.eup %460  ;;  %v344_v2 = vadd.f32 1.0, %v459_v63 }
 0x10d   :  { %v463_v3 = vpop.eup %462  ;;  %464 = vrcp.f32 %v342_v0  ;;  %v343_v4 = vadd.f32 1.0, %v461_v1 }
 0x10e   :  { %466 = vrcp.f32 %v344_v2  ;;  %v345_v5 = vadd.f32 1.0, %v463_v3 }
 0x10f   :  { %468 = vrcp.f32 %v343_v4 }
 0x110   :  { %470 = vrcp.f32 %v345_v5 }
 0x117   :  { %v465_v6 = vpop.eup %464 }
 0x118   :  { %v467_v7 = vpop.eup %466  ;;  %350 = vst [vmem:[%s622_s3] sm:$0xff] %v465_v6 }
 0x119   :  { %v469_v8 = vpop.eup %468  ;;  %352 = vst [vmem:[%s622_s3 + $0x10] sm:$0xff] %v467_v7 }
 0x11a   :  { %v471_v9 = vpop.eup %470  ;;  %351 = vst [vmem:[%s622_s3 + $0x8] sm:$0xff] %v469_v8 }
 0x11b   :  { %353 = vst [vmem:[%s622_s3 + $0x18] sm:$0xff] %v471_v9 }

</bundles_post_ra>
